<compile_context>
chip_gen: v6e
topology: v6e:2x2x1
jax: 0.10.0
libtpu: 0.0.40
codegen_flags: <defaults>
</compile_context>

<pallas_src>
import functools

import jax
import jax.numpy as jnp
from jax import lax
from jax.experimental import pallas as pl
from jax.experimental.pallas import tpu as pltpu

LANE = 128
SUBLANE = 8

# Conservative tile-sizing budget: fits comfortably under v7x's 64 MiB physical
# VMEM (and trivially under v5e/v6e's 128 MiB).
_VMEM_TILE_BUDGET = 32 * 1024 * 1024
_VMEM_LIMIT_BYTES = 40 * 1024 * 1024


def _round_up(x, m):
    return (x + m - 1) // m * m


def _pick_batch_tile(B, H, N_pad, block_b):
    """Largest batch tile (rows) that fits the VMEM budget, capped at block_b."""
    h_lane = _round_up(H, LANE)                      # hidden block is lane-padded in VMEM
    per_row = 2 * (h_lane * 4 + N_pad * 2)           # dbl-buffered f32 in + bf16 out
    fixed = 2 * _round_up(H, SUBLANE) * N_pad * 2    # dbl-buffered resident bf16 weight
    cap = max(SUBLANE, (_VMEM_TILE_BUDGET - fixed) // per_row)
    tm = int(min(block_b, cap))
    tm -= tm % SUBLANE
    tm = max(tm, SUBLANE)
    if tm >= B:
        # Whole batch fits in one tile.  For big batches split into >=2 steps so
        # the "parallel" axis can shard across v7x's two TensorCores; otherwise
        # use a single full-batch block (block == full array dim, so the (8,128)
        # divisibility rule is satisfied even for tiny B).
        tm = _round_up((B + 1) // 2, SUBLANE) if B >= 4096 else B
    return tm


def _head_kernel(hidden_ref, w_ref, out_ref, *, out_dim):
    """out = hidden @ W_packed (bf16 MXU operands, f32 acc); clip first out_dim lanes."""
    h = hidden_ref[...].astype(jnp.bfloat16)          # in-kernel cast (free on VPU)
    acc = jnp.dot(h, w_ref[...], preferred_element_type=jnp.float32)
    # clip_tensor applies to y (first `out_dim` columns) only; xi is unclipped.
    col = lax.broadcasted_iota(jnp.int32, acc.shape, dimension=1)
    clipped = jnp.where(col < out_dim, jnp.clip(acc, -5.5, 5.5), acc)
    out_ref[...] = clipped.astype(out_ref.dtype)


@functools.partial(jax.jit,
                   static_argnames=("out_dim", "xi_size", "block_b", "out_dtype"))
def controller_head(hidden, w_packed, *, out_dim, xi_size,
                    block_b=8192, out_dtype=jnp.bfloat16):
    """hidden: [B, H] float, w_packed: [H, N_pad] bf16 (N_pad % 128 == 0).

    Returns (y [B, out_dim] clipped, xi [B, xi_size]) in `out_dtype`.
    """
    B, H = hidden.shape
    N_pad = w_packed.shape[1]

    tm = _pick_batch_tile(B, H, N_pad, block_b)
    grid = (pl.cdiv(B, tm),)

    out_bytes = jnp.dtype(out_dtype).itemsize
    cost = pl.CostEstimate(
        flops=2 * B * H * N_pad,
        transcendentals=0,
        bytes_accessed=B * H * hidden.dtype.itemsize
        + H * N_pad * 2
        + B * N_pad * out_bytes,
    )

    out = pl.pallas_call(
        functools.partial(_head_kernel, out_dim=out_dim),
        out_shape=jax.ShapeDtypeStruct((B, N_pad), out_dtype),
        grid_spec=pl.GridSpec(
            grid=grid,
            in_specs=[
                pl.BlockSpec((tm, H), lambda i: (i, 0)),      # hidden tile (f32)
                pl.BlockSpec((H, N_pad), lambda i: (0, 0)),   # packed weight, resident
            ],
            out_specs=pl.BlockSpec((tm, N_pad), lambda i: (i, 0)),
        ),
        compiler_params=pltpu.CompilerParams(
            dimension_semantics=("parallel",),
            vmem_limit_bytes=_VMEM_LIMIT_BYTES,
        ),
        cost_estimate=cost,
    )(hidden, w_packed)

    # Slices fuse into this jit (no separate slab re-read from a later dispatch);
    # pad lanes never leak downstream.
    y = out[:, :out_dim]
    xi = out[:, out_dim:out_dim + xi_size]
    return y, xi


def concatenate_vectors(x, y):
    """torch.cat((x, y), 1) equivalent — pure glue, stays in plain JAX."""
    return jnp.concatenate([x, y], axis=1)


class BaseControllerPallas:
    def __init__(self, inputDim, hiddenDim, num_layers, outputDim, W, R, key):
        self.inputDim = inputDim
        self.hiddenDim = hiddenDim
        self.num_layers = num_layers
        self.outputDim = outputDim
        self.W = W
        self.num_read_heads = R
        self.xi_size = W * R + 3 * W + 5 * R + 3
        self.input_size = inputDim + R * W

        ky, kxi = jax.random.split(key)
        # nn.Linear default init ~ U(-1/sqrt(fan_in), 1/sqrt(fan_in)); weight
        # shape is (out, in).  Deterministic synthetic init (f32 master copy).
        bound = 1.0 / jnp.sqrt(jnp.float32(hiddenDim))
        self.wy = jax.random.uniform(ky, (outputDim, hiddenDim),
                                     jnp.float32, -bound, bound)
        self.wxi = jax.random.uniform(kxi, (self.xi_size, hiddenDim),
                                      jnp.float32, -bound, bound)

        # Pack once: [H, O] ++ [H, XI] -> [H, O+XI], zero-pad lanes to a
        # multiple of 128 (lane-dense output slab), cast to bf16 for the MXU.
        packed = jnp.concatenate([self.wy.T, self.wxi.T], axis=1)
        n_total = outputDim + self.xi_size
        n_pad = _round_up(n_total, LANE)
        if n_pad != n_total:
            packed = jnp.pad(packed, ((0, 0), (0, n_pad - n_total)))
        self.w_packed = packed.astype(jnp.bfloat16)

    def clip_tensor(self, t):
        return jnp.clip(t, -5.5, 5.5)

    # forward() is abstract in the PyTorch module; this implements the
    # canonical DNC-controller head: concat(input, reads) plus the two hidden
    # projections (y clipped, xi raw), fused into a single Pallas matmul.
    def forward(self, inp, hidden_state, read_vectors):
        B = inp.shape[0]
        reads_flat = read_vectors.reshape(B, self.num_read_heads * self.W)
        ctrl_input = concatenate_vectors(inp, reads_flat)  # [B, input_size]
        y, xi = controller_head(hidden_state, self.w_packed,
                                out_dim=self.outputDim, xi_size=self.xi_size)
        return ctrl_input, y, xi


if __name__ == "__main__":
    # Small shapes consistent with the module's __init__.
    inputDim, hiddenDim, num_layers, outputDim = 4, 32, 1, 16
    W, R = 8, 2
    B = 2

    key = jax.random.PRNGKey(0)
    kp, ki, kh, kr = jax.random.split(key, 4)

    ctrl = BaseControllerPallas(inputDim, hiddenDim, num_layers,
                                outputDim, W, R, kp)

    x = jax.random.normal(ki, (B, inputDim), jnp.float32)
    hidden = jax.random.normal(kh, (B, hiddenDim), jnp.float32)
    reads = jax.random.normal(kr, (B, R, W), jnp.float32)

    ctrl_input, y, xi = ctrl.forward(x, hidden, reads)
    jax.block_until_ready((ctrl_input, y, xi))

    assert ctrl_input.shape == (B, ctrl.input_size)
    assert y.shape == (B, outputDim) and xi.shape == (B, ctrl.xi_size)

    # f32 reference (kernel uses bf16 operands + bf16 output, so loose tol).
    y_ref_f32 = jnp.clip(hidden @ ctrl.wy.T, -5.5, 5.5)
    xi_ref_f32 = hidden @ ctrl.wxi.T
    assert jnp.allclose(y.astype(jnp.float32), y_ref_f32, atol=5e-2, rtol=5e-2)
    assert jnp.allclose(xi.astype(jnp.float32), xi_ref_f32, atol=5e-2, rtol=5e-2)

    # bf16-operand / bf16-output reference (what the kernel actually computes).
    h_b = hidden.astype(jnp.bfloat16)
    y_ref_bf = jnp.clip(
        jnp.dot(h_b, ctrl.w_packed[:, :outputDim],
                preferred_element_type=jnp.float32),
        -5.5, 5.5).astype(jnp.bfloat16)
    xi_ref_bf = jnp.dot(
        h_b, ctrl.w_packed[:, outputDim:outputDim + ctrl.xi_size],
        preferred_element_type=jnp.float32).astype(jnp.bfloat16)
    assert jnp.allclose(y.astype(jnp.float32), y_ref_bf.astype(jnp.float32),
                        atol=2e-2, rtol=2e-2)
    assert jnp.allclose(xi.astype(jnp.float32), xi_ref_bf.astype(jnp.float32),
                        atol=2e-2, rtol=2e-2)

    print("KERNEL_OK")
</pallas_src>

<mosaic_0001>
module attributes {stable_mosaic.version = 11 : i64} {
  func.func @_head_kernel(%arg0: i32, %arg1: memref<2x32xf32, #tpu.memory_space<vmem>>, %arg2: memref<32x128xbf16, #tpu.memory_space<vmem>>, %arg3: memref<2x128xbf16, #tpu.memory_space<vmem>>) attributes {dimension_semantics = [#tpu.dimension_semantics<parallel>], iteration_bounds = array<i64: 1>, scalar_prefetch = 0 : i64, scratch_operands = 0 : i64, tpu.core_type = #tpu.core_type<tc>, window_params = [{transform_indices = @transform_0, window_bounds = array<i64: 2, 32>}, {pipeline_mode = #tpu.pipeline_mode<synchronous>, transform_indices = @transform_1, window_bounds = array<i64: 32, 128>}, {transform_indices = @transform_2, window_bounds = array<i64: 2, 128>}]} {
    %c0 = arith.constant 0 : index
    %c0_0 = arith.constant 0 : index
    %0 = vector.load %arg1[%c0, %c0_0] : memref<2x32xf32, #tpu.memory_space<vmem>>, vector<2x32xf32>
    %1 = arith.truncf %0 : vector<2x32xf32> to vector<2x32xbf16>
    %c0_1 = arith.constant 0 : index
    %c0_2 = arith.constant 0 : index
    %2 = vector.load %arg2[%c0_1, %c0_2] : memref<32x128xbf16, #tpu.memory_space<vmem>>, vector<32x128xbf16>
    %cst = arith.constant dense<0.000000e+00> : vector<2x128xf32>
    %3 = tpu.matmul %1, %2, %cst {dimension_numbers = #tpu.dot_dimension_numbers<[1], [0], [0], [1], [0, 0, 1, 1], [], []>} : vector<2x32xbf16>, vector<32x128xbf16>, vector<2x128xf32> -> vector<2x128xf32>
    %4 = tpu.iota {dimensions = array<i32: 1>} : vector<2x128xi32>
    %c16_i32 = arith.constant 16 : i32
    %5 = vector.broadcast %c16_i32 : i32 to vector<2x128xi32>
    %6 = arith.cmpi slt, %4, %5 : vector<2x128xi32>
    %cst_3 = arith.constant -5.500000e+00 : f32
    %cst_4 = arith.constant 5.500000e+00 : f32
    %7 = vector.broadcast %cst_3 : f32 to vector<2x128xf32>
    %8 = arith.maximumf %7, %3 : vector<2x128xf32>
    %9 = vector.broadcast %cst_4 : f32 to vector<2x128xf32>
    %10 = arith.minimumf %9, %8 : vector<2x128xf32>
    %11 = arith.select %6, %10, %3 : vector<2x128xi1>, vector<2x128xf32>
    %12 = arith.truncf %11 : vector<2x128xf32> to vector<2x128xbf16>
    %c0_5 = arith.constant 0 : index
    %c0_6 = arith.constant 0 : index
    %13 = vector.load %arg3[%c0_5, %c0_6] : memref<2x128xbf16, #tpu.memory_space<vmem>>, vector<2x128xbf16>
    tpu.vector_store %arg3[%c0_5, %c0_6], %12 {strides = array<i32>} : memref<2x128xbf16, #tpu.memory_space<vmem>>, vector<2x128xbf16>,
    return
  }
  func.func @transform_0(%arg0: i32) -> (i32, i32) {
    %c0_i32 = arith.constant 0 : i32
    %c0_i32_0 = arith.constant 0 : i32
    return %arg0, %c0_i32 : i32, i32
  }
  func.func @transform_1(%arg0: i32) -> (i32, i32) {
    %c0_i32 = arith.constant 0 : i32
    %c0_i32_0 = arith.constant 0 : i32
    %c0_i32_1 = arith.constant 0 : i32
    return %c0_i32, %c0_i32_0 : i32, i32
  }
  func.func @transform_2(%arg0: i32) -> (i32, i32) {
    %c0_i32 = arith.constant 0 : i32
    %c0_i32_0 = arith.constant 0 : i32
    return %arg0, %c0_i32 : i32, i32
  }
}

</mosaic_0001>

<bundles_post_ra>
// kernel: controller_head.1
= control target key start
LH: loop header
LB: loop body
LE: loop exit
PB: predicated region body
PF: predicated region fallthrough
CT: control target
= control target key end

     0   :  { %7 = vsyncpa [#allocation3], 0  ;;  %s211_s0 = inlined_call_operand.hbm [shape: f32[2,32], index: 0, kind: input, shape index: {}]   ;;  %s212_s1 = inlined_call_operand.hbm [shape: bf16[32,128], index: 1, kind: input, shape index: {}]   ;;  %s213_s2 = inlined_call_operand.vmem [shape: bf16[2,128], index: 2, kind: output, shape index: {}]  }
   0x1   :  { %8 = vsyncpa [#allocation5], 0  ;;  %s181_s9 = smov [#allocation2]   ;;  %s182_s11 = smov [#allocation4]  }
   0x2   :  { %s15_s10 = sshll.u32 %s181_s9, 4  ;;  %s24_s12 = sshll.u32 %s182_s11, 4  ;;  %s16_s10 = int_to_ptr.vmem [resolvable:$true] %s15_s10  ;;  %s25_s12 = int_to_ptr.vmem [resolvable:$true] %s24_s12 }
   0x3   :  { %s145_s13 = scalar_lea.vmem %s16_s10, 32  ;;  %p150_p1 = scmp.lt.s32.totalorder %s16_s10, %s16_s10 }
   0x4   :  { %p146_p0 = scmp.ne.s32.totalorder %s16_s10, %s145_s13  ;;  %p151_p2 = scmp.lt.s32.totalorder %s145_s13, %s145_s13 }
   0x6   :  { %p152_p3 = por %p151_p2, %p150_p1 }
   0x8   :  { %p153_p4 = pnand %p152_p3, %p146_p0 }
   0xa   :  { %156 = shalt.err (!%p153_p4)
}
   0xb   :  { %18 = dma.hbm_to_vmem [thread:$0]  %s211_s0, 32, %s16_s10, [#allocation3]  }
   0xc   :  { %s165_s16 = scalar_lea.vmem %s25_s12, 256  ;;  %p170_p6 = scmp.lt.s32.totalorder %s25_s12, %s25_s12 }
   0xd   :  { %p166_p5 = scmp.ne.s32.totalorder %s25_s12, %s165_s16  ;;  %p171_p7 = scmp.lt.s32.totalorder %s165_s16, %s165_s16 }
   0xf   :  { %p172_p8 = por %p171_p7, %p170_p6 }
  0x11   :  { %p173_p9 = pnand %p172_p8, %p166_p5 }
  0x13   :  { %176 = shalt.err (!%p173_p9)
}
  0x14   :  { %s183_s17 = smov 64   ;;  %s184_s18 = smov 4  }
  0x15   :  { %30 = dma.hbm_to_vmem [thread:$0]  %s212_s1, 256, %s25_s12, [#allocation5], %s183_s17, %s183_s17, %s184_s18  }
  0x16   :  { %177 = dma.done.wait [#allocation3], 32  }
  0x17   :  { %178 = vsyncadd [#allocation3], 4294967264 }
  0x18   :  { %179 = dma.done.wait [#allocation5], 256  }
  0x19   :  { %180 = vsyncadd [#allocation5], 4294967040  ;;  %v185_v0 = vmov 0.0   ;;  %vm186_vm0 = vmmov 0   ;;  %v135_v1 = vld [vmem:[#allocation4 + $0x8] sm:$0xff]   ;;  %v136_v2 = vld [vmem:[#allocation4] sm:$0xff]   ;;  %v100_v5 = vlaneseq }
  0x1a   :  { %121 = vmatprep.subr.bf16.mxu0 %v185_v0  ;;  %125 = vmatprep.mubr.msk.bf16.mxu0 %vm186_vm0, %v185_v0  ;;  %v38_v3 = vld [vmem:[#allocation2] sm:$0x3]  ;;  %vm56_vm1 = vcmask 261120  }
  0x1b   :  { %122 = vmatpush3.bf16.msra.mxu0 %v135_v1  ;;  %v39_v4 = vpack.c.bf16 %v38_v3, %v38_v3  ;;  %v101_v6 = vand.u32 127, %v100_v5 }
  0x1c   :  { %123 = vmatprep.subr.bf16.mxu0 %v185_v0 }
  0x1d   :  { %vm102_vm2 = vcmp.lt.s32.totalorder %v101_v6, 16 }
  0x1f   :  { %124 = vmatpush3.bf16.msra.mxu0 %v136_v2 }
  0x22   :  { %126 = vmatmul.mubr.msk.bf16.vlgmr.msra.gmra.mxu0 %vm56_vm1, %v39_v4 }
  0xe2   :  { %v94_v7 = vpop.f32.mrf.mxu0 }
  0xe3   :  { %v117_v8 = vclamps-f32 %v94_v7, 5.5 }
  0xe4   :  { %v127_v9 = vpop.f32.mrf.mxu0 }
  0xe5   :  { %v105_v10 = vsel %vm102_vm2, %v117_v8, %v94_v7 }
  0xe6   :  { %v106_v11 = vpack.c.bf16 %v105_v10, %v105_v10  ;;  %v97_v12 = vpop.f32.mrf.mxu0 }
  0xe8   :  { %107 = vst [vmem:[%s213_s2] sm:$0x1] %v106_v11  ;;  %v128_v13 = vpop.f32.mrf.mxu0 }
  0xe9   :  { %112 = vsyncpa [#allocation3], 1 }
  0xea   :  { %113 = vsyncpa [#allocation5], 1 }

</bundles_post_ra>
